<compile_context>
chip_gen: v7x
topology: tpu7x:2x2x1
jax: 0.10.0
libtpu: 0.0.40
codegen_flags: <defaults>
</compile_context>

<pallas_src>
import functools
import math

import numpy as np
import jax
import jax.numpy as jnp
from jax import lax
from jax.experimental import pallas as pl
from jax.experimental.pallas import tpu as pltpu

LEAKY_SLOPE = 0.01
BN_EPS = 1e-5
VMEM = pltpu.MemorySpace.VMEM


# ----------------------- init-time weight preprocessing --------------------- #

def _convT_block_weights(w_pt, bias, level, pad_cols_to=None):
    """ConvTranspose2d(k=3,s=2,p=1,op=1) as ONE fused block matrix.

    Activation columns are (h, c) with h = ybits * 2**level + xbits (parity
    history); the output appends one parity bit to ybits/xbits.  The 4 row
    shift variants (carries into the coarse (a0, b0) grid: none / b0+1 / a0+1 /
    both) are stacked along the K axis so the whole deconv is a single MXU
    matmul against x_cat = [x, shift(x,1)*mb, shift(x,h0)*ma, shift(x,h0+1)*mab].
    """
    w = np.asarray(w_pt, dtype=np.float32)          # [Ci, Co, 3, 3] (torch layout)
    ci, co = w.shape[0], w.shape[1]
    half = 2 ** level
    g_in, g_out = half * half, 4 * half * half
    # sub-pixel taps: out[2i+py, 2j+px] = sum_{(dh,dw)} x[i+dh, j+dw] @ blk
    taps = {
        (0, 0): {(0, 0): w[:, :, 1, 1]},
        (0, 1): {(0, 0): w[:, :, 1, 2], (0, 1): w[:, :, 1, 0]},
        (1, 0): {(0, 0): w[:, :, 2, 1], (1, 0): w[:, :, 0, 1]},
        (1, 1): {(0, 0): w[:, :, 2, 2], (0, 1): w[:, :, 2, 0],
                 (1, 0): w[:, :, 0, 2], (1, 1): w[:, :, 0, 0]},
    }
    ws = np.zeros((4, g_in * ci, g_out * co), np.float32)
    for yb in range(half):
        for xb in range(half):
            for py in (0, 1):
                for px in (0, 1):
                    h_out = (yb * 2 + py) * (2 * half) + (xb * 2 + px)
                    for (dh, dw), blk in taps[(py, px)].items():
                        ny, cy = yb + dh, 0
                        if ny >= half:
                            ny, cy = ny - half, 1
                        nx, cx = xb + dw, 0
                        if nx >= half:
                            nx, cx = nx - half, 1
                        h_src = ny * half + nx
                        s = 2 * cy + cx
                        ws[s, h_src * ci:(h_src + 1) * ci,
                           h_out * co:(h_out + 1) * co] += blk
    w_cat = ws.reshape(4 * g_in * ci, g_out * co)    # variants stacked along K
    b_t = np.tile(np.asarray(bias, dtype=np.float32), g_out)[None, :]
    if pad_cols_to is not None and pad_cols_to > w_cat.shape[1]:
        extra = pad_cols_to - w_cat.shape[1]
        w_cat = np.pad(w_cat, ((0, 0), (0, extra)))      # lane-dense output
        b_t = np.pad(b_t, ((0, 0), (0, extra)))
    return w_cat, b_t


def precompute_params(params, *, max_num_filters, img_size):
    """Hoist all weight preprocessing out of the forward path (done once)."""
    c0 = max_num_filters
    c1, c2 = c0 // 2, c0 // 4
    h0 = img_size // 8
    s_sp = h0 * h0

    lw = np.asarray(params["lin_w"], np.float32)            # [c0*s_sp, L]
    lb = np.asarray(params["lin_b"], np.float32)
    latent = lw.shape[1]
    # torch .view(-1, C, H, W) => flat feature f = c*S + s : re-layout so the
    # kernel emits lin1 with ONE matmul directly as rows=(n, a0, b0), cols=c,
    # with the bias folded in as an extra "ones" input column per spatial s.
    wb = np.concatenate(
        [lw.reshape(c0, s_sp, latent), lb.reshape(c0, s_sp, 1)], axis=2)
    lin_wb = wb.transpose(1, 2, 0).reshape(s_sp * (latent + 1), c0)

    c3 = int(np.asarray(params["conv3_w"]).shape[1])
    d3 = 64 * c3
    d3_pad = ((d3 + 127) // 128) * 128                      # lane-dense width

    w1, b1 = _convT_block_weights(params["conv1_w"], params["conv1_b"], 0)
    w2, b2 = _convT_block_weights(params["conv2_w"], params["conv2_b"], 1)
    w3, b3 = _convT_block_weights(params["conv3_w"], params["conv3_b"], 2,
                                  pad_cols_to=d3_pad)

    # TODO(synk): once tolerances allow, store w1/w2/w3 (and cast activations
    # fed to the MXU) in bf16; keep BN stats / rsqrt / sigmoid in f32.
    return {
        "lin_wb": jnp.asarray(lin_wb),
        "w1": jnp.asarray(w1), "b1": jnp.asarray(b1),
        "w2": jnp.asarray(w2), "b2": jnp.asarray(b2),
        "w3": jnp.asarray(w3), "b3": jnp.asarray(b3),
        "g1": jnp.asarray(params["bn1_g"]).reshape(1, c1),
        "bb1": jnp.asarray(params["bn1_b"]).reshape(1, c1),
        "g2": jnp.asarray(params["bn2_g"]).reshape(1, c2),
        "bb2": jnp.asarray(params["bn2_b"]).reshape(1, c2),
    }


# ------------------------- pltpu.roll convention probe ---------------------- #

@functools.lru_cache(maxsize=None)
def _roll_matches_np_roll() -> bool:
    """One-time check of pltpu.roll's rotation convention.

    Returns True if pltpu.roll(x, s, axis) == np.roll(x, s, axis)
    (i.e. out[j] = in[j - s]).  Result is a Python bool used at trace time, so
    call this once outside jit (done in __main__) before the first jitted call.
    """
    def k(x_ref, o_ref):
        o_ref[...] = pltpu.roll(x_ref[...], 1, axis=0)

    x = jnp.arange(8 * 128, dtype=jnp.float32).reshape(8, 128)
    y = pl.pallas_call(
        k, out_shape=jax.ShapeDtypeStruct((8, 128), jnp.float32))(x)
    return bool(y[1, 0] == x[0, 0])


# ----------------------------- fused Pallas forward ------------------------- #

def decoder_forward(z, pre, *, num_img_channels, max_num_filters, img_size,
                    roll_like_np=True):
    c0 = max_num_filters
    c1, c2, c3 = c0 // 2, c0 // 4, num_img_channels
    h0 = img_size // 8                      # coarse grid side after lin1
    s_sp = h0 * h0
    n, latent = z.shape
    m0 = n * s_sp                           # fixed row count for ALL layers
    d3 = 64 * c3                            # final (unpadded) width
    d3_pad = pre["b3"].shape[1]             # lane-dense (padded) width
    npf = np.float32

    # Boundary masks for the three row-shift carries (structural, [m0, 3]).
    mask_np = np.zeros((m0, 3), npf)
    for bi in range(n):
        for a in range(h0):
            for b in range(h0):
                r = (bi * h0 + a) * h0 + b
                mask_np[r, 0] = float(b + 1 < h0)                 # b0 + 1
                mask_np[r, 1] = float(a + 1 < h0)                 # a0 + 1
                mask_np[r, 2] = float(a + 1 < h0 and b + 1 < h0)  # both
    masks = jnp.asarray(mask_np)

    # Block-diagonal layout of z (plus a ones column folding in the lin1 bias):
    # zsel[bi*s_sp + s, s'*(L+1) + l] = z1[bi, l] * (s == s').  Tiny XLA op.
    z1 = jnp.concatenate([z.astype(jnp.float32),
                          jnp.ones((n, 1), jnp.float32)], axis=1)
    eye = jnp.asarray(np.eye(s_sp, dtype=npf))
    zsel = (eye[None, :, :, None] * z1[:, None, None, :]).reshape(
        m0, s_sp * (latent + 1))

    inv_cnt1 = 1.0 / float(m0 * 4)          # = 1 / (N * OH1 * OW1)
    inv_cnt2 = 1.0 / float(m0 * 16)         # = 1 / (N * OH2 * OW2)

    def kernel(zsel_ref, lwb_ref, mask_ref, w1_ref, b1_ref, g1_ref, bb1_ref,
               w2_ref, b2_ref, g2_ref, bb2_ref, w3_ref, b3_ref, o_ref):
        dot = functools.partial(jnp.dot, preferred_element_type=jnp.float32)
        mb = mask_ref[:, 0:1]
        ma = mask_ref[:, 1:2]
        mab = mask_ref[:, 2:3]

        def shift_up(x, k):
            # out[r] = x[(r + k) % m0]; rows whose source crosses an (a0, b0) /
            # batch boundary (incl. the wrap-around rows) are zeroed by masks.
            amount = (m0 - k) % m0 if roll_like_np else k
            return pltpu.roll(x, amount, axis=0)

        def convT(x, w_ref, b_ref):
            # Single wide-K MXU matmul per deconv: 4 shift variants of the
            # input concatenated along lanes, block weights stacked along K.
            x_cat = jnp.concatenate(
                [x,
                 shift_up(x, 1) * mb,
                 shift_up(x, h0) * ma,
                 shift_up(x, h0 + 1) * mab], axis=1)
            return dot(x_cat, w_ref[...]) + b_ref[...]

        def bn_lrelu(y, g_ref, bb_ref, groups, ch, inv_count):
            # Training-mode BatchNorm2d over (N, H, W): one-pass sum / sumsq;
            # group fold and broadcast-back on the VPU (no M=1 MXU matmuls).
            ssum = jnp.sum(y, axis=0, keepdims=True)          # [1, G*C]
            ssq = jnp.sum(y * y, axis=0, keepdims=True)       # [1, G*C]

            def fold(v):
                acc = v[:, 0:ch]
                for g in range(1, groups):
                    acc = acc + v[:, g * ch:(g + 1) * ch]
                return acc

            mean = fold(ssum) * inv_count                     # [1, C]
            ex2 = fold(ssq) * inv_count                       # [1, C]
            var = jnp.maximum(ex2 - mean * mean, 0.0)
            scale = g_ref[...] * lax.rsqrt(var + BN_EPS)      # [1, C] (EUP)
            shift = bb_ref[...] - mean * scale                # [1, C]
            scale_t = jnp.concatenate([scale] * groups, axis=1)
            shift_t = jnp.concatenate([shift] * groups, axis=1)
            y = y * scale_t + shift_t
            return jnp.where(y > 0, y, LEAKY_SLOPE * y)       # F.leaky_relu(0.01)

        act = dot(zsel_ref[...], lwb_ref[...])                # lin1 (+ bias)
        act = bn_lrelu(convT(act, w1_ref, b1_ref), g1_ref, bb1_ref,
                       4, c1, inv_cnt1)
        act = bn_lrelu(convT(act, w2_ref, b2_ref), g2_ref, bb2_ref,
                       16, c2, inv_cnt2)
        o_ref[...] = jax.nn.sigmoid(convT(act, w3_ref, b3_ref))

    # TODO(synk): for large batch / img_size, tile the m0 row axis over a
    # ("parallel",) grid (lights up v7x's 2nd TensorCore), switch BN to a
    # cross-tile two-pass reduction, and budget per-block VMEM against v7x's
    # 64 MiB (BlockSpec double-buffers every input).  At these shapes a single
    # fused program keeps all live data (< 1 MiB) resident in VMEM, so the
    # default scoped-VMEM limit is ample (no vmem_limit_bytes override).
    a3 = pl.pallas_call(
        kernel,
        out_shape=jax.ShapeDtypeStruct((m0, d3_pad), jnp.float32),
        in_specs=[pl.BlockSpec(memory_space=VMEM)] * 13,
        out_specs=pl.BlockSpec(memory_space=VMEM),
    )(zsel, pre["lin_wb"], masks,
      pre["w1"], pre["b1"], pre["g1"], pre["bb1"],
      pre["w2"], pre["b2"], pre["g2"], pre["bb2"],
      pre["w3"], pre["b3"])

    # De-interleave: rows=(n,a0,b0), cols=(ybits, xbits, c); oy = 8*a0 + ybits.
    y = a3[:, :d3].reshape(n, h0, h0, 8, 8, c3)
    y = jnp.transpose(y, (0, 5, 1, 3, 2, 4))
    return y.reshape(n, c3, img_size, img_size)


# ----------------------- deterministic parameter init ----------------------- #

def init_params(key, num_latent_dims, num_img_channels, max_num_filters, img_size):
    nf1, nf2, nf3 = max_num_filters, max_num_filters // 2, max_num_filters // 4
    s0 = img_size // 8
    flat = nf1 * s0 * s0
    ks = jax.random.split(key, 8)

    def u(k, shape, fan_in):
        bound = 1.0 / math.sqrt(fan_in)
        return jax.random.uniform(k, shape, jnp.float32, -bound, bound)

    return {
        "lin_w": u(ks[0], (flat, num_latent_dims), num_latent_dims),
        "lin_b": u(ks[1], (flat,), num_latent_dims),
        "conv1_w": u(ks[2], (nf1, nf2, 3, 3), nf1 * 9),
        "conv1_b": u(ks[3], (nf2,), nf1 * 9),
        "conv2_w": u(ks[4], (nf2, nf3, 3, 3), nf2 * 9),
        "conv2_b": u(ks[5], (nf3,), nf2 * 9),
        "conv3_w": u(ks[6], (nf3, num_img_channels, 3, 3), nf3 * 9),
        "conv3_b": u(ks[7], (num_img_channels,), nf3 * 9),
        "bn1_g": jnp.ones((nf2,), jnp.float32), "bn1_b": jnp.zeros((nf2,), jnp.float32),
        "bn2_g": jnp.ones((nf3,), jnp.float32), "bn2_b": jnp.zeros((nf3,), jnp.float32),
        # shortcut1 / shortcut2 exist in __init__ but are unused in forward().
    }


# --------------------------- plain-JAX reference ---------------------------- #

def ref_forward(z, p, *, num_img_channels, max_num_filters, img_size):
    nf1 = max_num_filters
    s0 = img_size // 8
    x = z @ p["lin_w"].T + p["lin_b"]
    x = x.reshape(-1, nf1, s0, s0)

    def convT(x_nchw, w_pt, b):
        x_nhwc = jnp.transpose(x_nchw, (0, 2, 3, 1))
        w_hwio = jnp.transpose(w_pt[:, :, ::-1, ::-1], (2, 3, 0, 1))
        y = lax.conv_general_dilated(
            x_nhwc, w_hwio, window_strides=(1, 1), padding=((1, 2), (1, 2)),
            lhs_dilation=(2, 2), dimension_numbers=("NHWC", "HWIO", "NHWC"))
        y = y + b
        return jnp.transpose(y, (0, 3, 1, 2))

    def bn_train(v, g, b_):
        mu = jnp.mean(v, axis=(0, 2, 3), keepdims=True)
        var = jnp.mean((v - mu) ** 2, axis=(0, 2, 3), keepdims=True)
        vn = (v - mu) * lax.rsqrt(var + BN_EPS)
        return vn * g.reshape(1, -1, 1, 1) + b_.reshape(1, -1, 1, 1)

    def lrelu(v):
        return jnp.where(v > 0, v, LEAKY_SLOPE * v)

    x = lrelu(bn_train(convT(x, p["conv1_w"], p["conv1_b"]), p["bn1_g"], p["bn1_b"]))
    x = lrelu(bn_train(convT(x, p["conv2_w"], p["conv2_b"]), p["bn2_g"], p["bn2_b"]))
    x = jax.nn.sigmoid(convT(x, p["conv3_w"], p["conv3_b"]))
    return x


# ----------------------------------- main ----------------------------------- #

if __name__ == "__main__":
    num_latent_dims = 8
    num_img_channels = 3
    max_num_filters = 32
    img_size = 32
    batch = 2

    key = jax.random.PRNGKey(0)
    kz, kp = jax.random.split(key)
    params = init_params(kp, num_latent_dims, num_img_channels, max_num_filters, img_size)
    z = jax.random.normal(kz, (batch, num_latent_dims), jnp.float32)

    pre = precompute_params(params, max_num_filters=max_num_filters, img_size=img_size)
    roll_like_np = _roll_matches_np_roll()      # one-time probe, outside jit

    fwd = jax.jit(functools.partial(
        decoder_forward, num_img_channels=num_img_channels,
        max_num_filters=max_num_filters, img_size=img_size,
        roll_like_np=roll_like_np))
    out = jax.block_until_ready(fwd(z, pre))

    ref = ref_forward(z, params, num_img_channels=num_img_channels,
                      max_num_filters=max_num_filters, img_size=img_size)

    assert out.shape == (batch, num_img_channels, img_size, img_size), out.shape
    assert bool(jnp.all(jnp.isfinite(out)))
    assert bool(jnp.allclose(out, ref, atol=1e-3, rtol=1e-3)), "mismatch vs JAX reference"
    print("KERNEL_OK")
</pallas_src>

<mosaic_0001>
module attributes {stable_mosaic.version = 11 : i64} {
  func.func @k(%arg0: memref<8x128xf32, #tpu.memory_space<vmem>>, %arg1: memref<8x128xf32, #tpu.memory_space<vmem>>) attributes {dimension_semantics = [], scalar_prefetch = 0 : i64, scratch_operands = 0 : i64, tpu.core_type = #tpu.core_type<tc>} {
    %c0 = arith.constant 0 : index
    %c0_0 = arith.constant 0 : index
    %0 = vector.load %arg0[%c0, %c0_0] : memref<8x128xf32, #tpu.memory_space<vmem>>, vector<8x128xf32>
    %c1_i32 = arith.constant 1 : i32
    %1 = tpu.dynamic_rotate %0 by %c1_i32 dim 0 : vector<8x128xf32>, i32 -> vector<8x128xf32>
    %c0_1 = arith.constant 0 : index
    %c0_2 = arith.constant 0 : index
    %2 = vector.load %arg1[%c0_1, %c0_2] : memref<8x128xf32, #tpu.memory_space<vmem>>, vector<8x128xf32>
    tpu.vector_store %arg1[%c0_1, %c0_2], %1 {strides = array<i32>} : memref<8x128xf32, #tpu.memory_space<vmem>>, vector<8x128xf32>,
    return
  }
}

</mosaic_0001>

<bundles_post_ra>
// kernel: tpu_custom_call.1
= control target key start
LH: loop header
LB: loop body
LE: loop exit
PB: predicated region body
PF: predicated region fallthrough
CT: control target
= control target key end

     0   :  { %6 = vsyncpa [#allocation3], 0  ;;  %s125_s0 = inlined_call_operand.hbm [shape: f32[8,128], index: 0, kind: input, shape index: {}]   ;;  %s126_s1 = inlined_call_operand.hbm [shape: f32[8,128], index: 1, kind: output, shape index: {}]  }
   0x1   :  { %7 = vsyncpa [#allocation4], 0  ;;  %s89_s6 = smov [#allocation2]   ;;  %s41_s10 = scalar_lea.hbm %s125_s0, 128 }
   0x2   :  { %s14_s7 = sshll.u32 %s89_s6, 4  ;;  %p42_p0 = scmp.ne.s32.totalorder %s125_s0, %s41_s10  ;;  %s15_s7 = int_to_ptr.vmem [resolvable:$true] %s14_s7 }
   0x3   :  { %p45_p1 = scmp.lt.u32.totalorder %s41_s10, %s125_s0 }
   0x5   :  { %p47_p2 = pnand %p45_p1, %p42_p0 }
   0x7   :  { %50 = shalt.err (!%p47_p2)
}
   0x8   :  { %s51_s15 = scalar_lea.vmem %s15_s7, 128  ;;  %p56_p4 = scmp.lt.s32.totalorder %s15_s7, %s15_s7 }
   0x9   :  { %p52_p3 = scmp.ne.s32.totalorder %s15_s7, %s51_s15  ;;  %p57_p5 = scmp.lt.s32.totalorder %s51_s15, %s51_s15 }
   0xb   :  { %p58_p6 = por %p57_p5, %p56_p4 }
   0xd   :  { %p59_p7 = pnand %p58_p6, %p52_p3 }
   0xf   :  { %62 = shalt.err (!%p59_p7)
}
  0x10   :  { %17 = dma.hbm_to_vmem [thread:$0]  %s125_s0, 128, %s15_s7, [#allocation3]  }
  0x11   :  { %85 = dma.done.wait [#allocation3], 128  }
  0x12   :  { %86 = vsyncadd [#allocation3], 4294967168  ;;  %s90_s18 = smov [#allocation5]   ;;  %v21_v0 = vld [vmem:[#allocation2] sm:$0xff] }
  0x13   :  { %s30_s19 = sshll.u32 %s90_s18, 4  ;;  %v22_v1 = vrot.slane %v21_v0, 7  ;;  %s31_s19 = int_to_ptr.vmem [resolvable:$true] %s30_s19 }
  0x14   :  { %s63_s20 = scalar_lea.vmem %s31_s19, 128  ;;  %p68_p9 = scmp.lt.s32.totalorder %s31_s19, %s31_s19 }
  0x15   :  { %23 = vst [vmem:[#allocation5] sm:$0xff] %v22_v1  ;;  %p64_p8 = scmp.ne.s32.totalorder %s31_s19, %s63_s20  ;;  %p69_p10 = scmp.lt.s32.totalorder %s63_s20, %s63_s20 }
  0x17   :  { %p70_p11 = por %p69_p10, %p68_p9 }
  0x19   :  { %p71_p12 = pnand %p70_p11, %p64_p8 }
  0x1b   :  { %74 = shalt.err (!%p71_p12)
}
  0x1c   :  { %s75_s23 = scalar_lea.hbm %s126_s1, 128 }
  0x1d   :  { %p76_p13 = scmp.ne.s32.totalorder %s126_s1, %s75_s23  ;;  %p79_p0 = scmp.lt.u32.totalorder %s75_s23, %s126_s1 }
  0x1f   :  { %p81_p1 = pnand %p79_p0, %p76_p13 }
  0x21   :  { %84 = shalt.err (!%p81_p1)
}
  0x22   :  { %33 = dma.vmem_to_hbm [thread:$0]  %s31_s19, 128, %s126_s1, [#allocation4]  }
  0x23   :  { %87 = dma.done.wait [#allocation4], 128  }
  0x24   :  { %88 = vsyncadd [#allocation4], 4294967168 }
  0x25   :  { %37 = vsyncpa [#allocation3], 1 }
  0x26   :  { %38 = vsyncpa [#allocation4], 1 }

</bundles_post_ra>
